<compile_context>
chip_gen: v7x
topology: tpu7x:2x2x1
jax: 0.10.0
libtpu: 0.0.40
codegen_flags: <defaults>
</compile_context>

<pallas_src>
import functools

import jax
import jax.numpy as jnp
from jax.experimental import pallas as pl
from jax.experimental.pallas import tpu as pltpu

F32 = jnp.float32
BF16 = jnp.bfloat16
EPS = 1e-5
NEG = -1e30

OBJ = {'inter_labels': {'distance': ('PP', 'CC', 'NN'),
                        'contact': ('PP', 'CC', 'NN')}}
N_BINS = {'inter_labels': {'distance': 40, 'contact': 1}}
N_DIST_LANES = len(OBJ['inter_labels']['distance']) * N_BINS['inter_labels']['distance']  # 120
N_CONT_LANES = len(OBJ['inter_labels']['contact']) * N_BINS['inter_labels']['contact']    # 3
SS_LANE = N_DIST_LANES + N_CONT_LANES                                                     # 123
FUSED_HEAD_WIDTH = 128
RECYCLE_BINS = 38
RECYCLE_BINS_PAD = 40


# ----------------------------- generation-aware sizing ----------------------

def _detect_vmem_capacity():
    try:
        info = pltpu.get_tpu_info()
        cap = getattr(info, "vmem_capacity_bytes", None)
        if cap:
            return int(cap)
    except Exception:
        pass
    return 128 * 1024 * 1024


_VMEM_CAP = _detect_vmem_capacity()
if _VMEM_CAP <= 96 * 1024 * 1024:          # v7x: 64 MiB physical per TensorCore
    VMEM_LIMIT = 40 * 1024 * 1024
    ROW_TILE_TARGET = 2048
else:                                       # v5e / v6e: 128 MiB
    VMEM_LIMIT = 64 * 1024 * 1024
    ROW_TILE_TARGET = 4096


# ----------------------------- small helpers --------------------------------

def _round_up(x, m):
    return (x + m - 1) // m * m


def _row_plan(R):
    """Tile size / padded extent for a row-streamed (R, C) array.  TR is a multiple
    of 32 (satisfies f32/bf16/int32 sublane tiling); R is padded up to a multiple of
    TR with zero rows (all kernels here tolerate / mask padded rows)."""
    TR = min(ROW_TILE_TARGET, _round_up(R, 32))
    Rp = _round_up(R, TR)
    return TR, Rp


def _mosaic(sem):
    return pltpu.CompilerParams(dimension_semantics=sem,
                                vmem_limit_bytes=VMEM_LIMIT)


def _row_call(kernel, tiled_ins, full_ins, out_shapes, sem="parallel"):
    """Row-tiled pallas_call: arrays in `tiled_ins` / `out_shapes` are (R, C_k) and
    streamed in (TR, C_k) blocks (rows zero-padded to a multiple of TR); `full_ins`
    (weights / stats / biases) stay resident in VMEM.  Outputs are sliced back to R."""
    R = tiled_ins[0].shape[0]
    TR, Rp = _row_plan(R)
    if Rp != R:
        tiled_ins = [jnp.pad(a, ((0, Rp - R), (0, 0))) for a in tiled_ins]
    multi = isinstance(out_shapes, (tuple, list))
    outs = tuple(out_shapes) if multi else (out_shapes,)
    outs_p = tuple(jax.ShapeDtypeStruct((Rp, s.shape[1]), s.dtype) for s in outs)
    in_specs = ([pl.BlockSpec((TR, a.shape[1]), lambda r: (r, 0)) for a in tiled_ins]
                + [pl.BlockSpec(a.shape, lambda r: (0, 0)) for a in full_ins])
    out_specs = tuple(pl.BlockSpec((TR, s.shape[1]), lambda r: (r, 0)) for s in outs_p)
    res = pl.pallas_call(
        kernel,
        out_shape=outs_p if multi else outs_p[0],
        grid=(Rp // TR,),
        in_specs=in_specs,
        out_specs=out_specs if multi else out_specs[0],
        compiler_params=_mosaic((sem,)),
    )(*tiled_ins, *full_ins)
    res = res if multi else (res,)
    res = tuple(r[:R] for r in res)
    return res if multi else res[0]


def _ln_affine(x, g, b):
    mu = jnp.mean(x, axis=-1, keepdims=True)
    var = jnp.mean((x - mu) ** 2, axis=-1, keepdims=True)
    return (x - mu) * jax.lax.rsqrt(var + EPS) * g + b


# ----------------------------- kernels --------------------------------------

def _channel_stats_kernel(x_ref, sum_ref, sq_ref):
    # InstanceNorm pass 1 for the input embedder (runs once; zero-padded rows
    # contribute nothing): per-channel sum / sumsq, resident accumulators.
    @pl.when(pl.program_id(0) == 0)
    def _init():
        sum_ref[...] = jnp.zeros_like(sum_ref)
        sq_ref[...] = jnp.zeros_like(sq_ref)

    x = x_ref[...].astype(F32)
    sum_ref[...] += jnp.sum(x, axis=0, keepdims=True)
    sq_ref[...] += jnp.sum(x * x, axis=0, keepdims=True)


def _instnorm_elu_linear_kernel(x_ref, mu_ref, rstd_ref, g_ref, b_ref, w_ref, wb_ref, o_ref):
    # InstanceNorm2d (stats precomputed) + affine + ELU + 1x1 conv (channel matmul).
    y = (x_ref[...].astype(F32) - mu_ref[...]) * rstd_ref[...] * g_ref[...] + b_ref[...]
    y = jnp.where(y > 0, y, jnp.exp(y) - 1.0)                  # ELU(alpha=1)
    o_ref[...] = (jnp.dot(y.astype(BF16), w_ref[...], preferred_element_type=F32)
                  + wb_ref[...]).astype(o_ref.dtype)


def _recycle_kernel(prev_ref, ie_ref, idx_ref, g_ref, b_ref, rw_ref, rb_ref,
                    o_ref, sum_ref, sq_ref, *, n_valid, tile_rows):
    # RecyclingEmbedder pair path fused with the `pair + rec_pair` add:
    #   pair_emb = InputEmbedder pair + LayerNorm(pair_prev) + Linear(one_hot(dist_bin)).
    # The distance-bin gather is done in-kernel (one-hot x resident (40,48) weight on
    # the MXU).  The kernel also emits per-channel sum/sumsq of the produced pair
    # tensor (masked to the valid rows) so the distogram InstanceNorm needs no extra
    # HBM read pass.  TODO(synk): re-home this stats fusion to the RNAformer output
    # kernel once net2d exists.
    @pl.when(pl.program_id(0) == 0)
    def _init():
        sum_ref[...] = jnp.zeros_like(sum_ref)
        sq_ref[...] = jnp.zeros_like(sq_ref)

    ln = _ln_affine(prev_ref[...].astype(F32), g_ref[...], b_ref[...])
    idx = idx_ref[...]                                          # (TR, 1) int32
    onehot = (jax.lax.broadcasted_iota(jnp.int32, (tile_rows, rw_ref.shape[0]), 1)
              == idx).astype(BF16)
    dlin = jnp.dot(onehot, rw_ref[...], preferred_element_type=F32) + rb_ref[...]
    out = ie_ref[...].astype(F32) + ln + dlin
    o_ref[...] = out.astype(o_ref.dtype)

    rows = pl.program_id(0) * tile_rows + jax.lax.broadcasted_iota(jnp.int32, out.shape, 0)
    valid = (rows < n_valid).astype(F32)                        # mask zero-padded rows
    ov = out * valid
    sum_ref[...] += jnp.sum(ov, axis=0, keepdims=True)
    sq_ref[...] += jnp.sum(ov * ov, axis=0, keepdims=True)


def _layernorm_kernel(x_ref, g_ref, b_ref, o_ref):
    o_ref[...] = _ln_affine(x_ref[...].astype(F32), g_ref[...], b_ref[...]).astype(o_ref.dtype)


def _cov_kernel(xt_ref, x_ref, o_ref):
    # fast_dca: cov block = xs^T[i-tile, :] @ xs[:, j-tile]; LHS pre-transposed in the
    # wrapper so this is a plain last-dim-contraction MXU matmul (scale folded in).
    o_ref[...] = jnp.dot(xt_ref[...], x_ref[...],
                         preferred_element_type=F32).astype(o_ref.dtype)


def _heads_ss_kernel(p_ref, pt_ref,
                     mu_ref, rstd_ref, dg_g_ref, dg_b_ref, wf_ref, bf_ref,
                     ln1g_ref, ln1b_ref, w1_ref, b1_ref, w2_ref, b2_ref,
                     ln2g_ref, ln2b_ref, w3_ref, b3_ref, o_ref):
    # ONE fused kernel over shared (TR,48) p2/pt2 tiles:
    #   Distogram: InstanceNorm+ELU -> Symm -> fused 123-wide head matmul
    #   to_ss:     LN -> Symm -> Linear -> Linear -> ReLU -> LN -> (Dropout=id) -> Linear(1)
    # followed by ONE exp + ONE approx reciprocal over 128 lanes (segmented softmax on
    # the 3x40 distance lanes, clamped sigmoid on contact + ss lanes).  Output is bf16.
    p = p_ref[...].astype(F32)
    pt = pt_ref[...].astype(F32)

    # ---- distogram branch
    mu, rstd = mu_ref[...], rstd_ref[...]
    g, b = dg_g_ref[...], dg_b_ref[...]

    def pre(v):
        y = (v - mu) * rstd * g + b
        return jnp.where(y > 0, y, jnp.exp(y) - 1.0)            # ELU(alpha=1)

    zd = 0.5 * (pre(p) + pre(pt))                               # Symm('b i j d->b j i d')
    logits = (jnp.dot(zd.astype(BF16), wf_ref[...], preferred_element_type=F32)
              + bf_ref[...])                                    # (TR, 128) fused heads

    # ---- to_ss branch (W1 hoisted through the symmetrization: Linear commutes with 0.5*(a+b))
    h = 0.5 * (_ln_affine(p, ln1g_ref[...], ln1b_ref[...])
               + _ln_affine(pt, ln1g_ref[...], ln1b_ref[...]))
    z = jnp.dot(h.astype(BF16), w1_ref[...], preferred_element_type=F32) + b1_ref[...]
    z = jnp.dot(z.astype(BF16), w2_ref[...], preferred_element_type=F32) + b2_ref[...]
    z = jnp.maximum(z, 0.0)
    z = _ln_affine(z, ln2g_ref[...], ln2b_ref[...])             # Dropout(0.1) = identity (eval)
    ss_logit = jnp.dot(z.astype(BF16), w3_ref[...], preferred_element_type=F32) + b3_ref[...]

    # ---- single exp / single reciprocal over all 128 lanes
    lane = jax.lax.broadcasted_iota(jnp.int32, logits.shape, 1)
    logits = jnp.where(lane == SS_LANE, ss_logit, logits)       # inject ss logit into pad lane
    is_dist = lane < N_DIST_LANES
    nb = N_BINS['inter_labels']['distance']

    segmax = jnp.zeros_like(logits)
    for s in range(len(OBJ['inter_labels']['distance'])):       # 3 masked maxes (XLU)
        seg = (lane >= s * nb) & (lane < (s + 1) * nb)
        m = jnp.max(jnp.where(seg, logits, NEG), axis=-1, keepdims=True)
        segmax = jnp.where(seg, m, segmax)

    adj = jnp.where(is_dist, logits - segmax, jnp.clip(logits, -30.0, 30.0))
    e = jnp.exp(adj)                                            # the ONLY 128-wide exp
    denom = 1.0 + e                                             # sigmoid denom for contact/ss lanes
    for s in range(len(OBJ['inter_labels']['distance'])):       # 3 masked sums
        seg = (lane >= s * nb) & (lane < (s + 1) * nb)
        ssum = jnp.sum(jnp.where(seg, e, 0.0), axis=-1, keepdims=True)
        denom = jnp.where(seg, ssum, denom)

    # approx reciprocal (EUP slot): probabilities sum to 1 only to ~1e-3 rel.; fine for inference.
    probs = e * pl.reciprocal(denom, approx=True)
    o_ref[...] = probs.astype(o_ref.dtype)


def _plddt_kernel(s_ref, g_ref, b_ref, w1_ref, b1_ref, w2_ref, b2_ref,
                  w3_ref, b3_ref, bins_ref, prob_ref, plddt_ref):
    # LN -> Linear -> ReLU -> Linear -> ReLU -> Linear(50) -> softmax -> <bins>.
    x = _ln_affine(s_ref[...].astype(F32), g_ref[...], b_ref[...])
    x = jnp.maximum(jnp.dot(x.astype(BF16), w1_ref[...], preferred_element_type=F32) + b1_ref[...], 0.0)
    x = jnp.maximum(jnp.dot(x.astype(BF16), w2_ref[...], preferred_element_type=F32) + b2_ref[...], 0.0)
    logits = jnp.dot(x.astype(BF16), w3_ref[...], preferred_element_type=F32) + b3_ref[...]
    m = jnp.max(logits, axis=-1, keepdims=True)
    e = jnp.exp(logits - m)
    prob = e * pl.reciprocal(jnp.sum(e, axis=-1, keepdims=True), approx=True)
    prob_ref[...] = prob.astype(prob_ref.dtype)
    plddt_ref[...] = jnp.sum(prob * bins_ref[...], axis=-1,
                             keepdims=True).astype(plddt_ref.dtype)


# ----------------------------- pallas wrappers -------------------------------

def _channel_stats(x2d):
    """InstanceNorm pass 1 for the input embedder (zero-padded rows are harmless)."""
    R, C = x2d.shape
    TR, Rp = _row_plan(R)
    xp = jnp.pad(x2d, ((0, Rp - R), (0, 0))) if Rp != R else x2d
    s, sq = pl.pallas_call(
        _channel_stats_kernel,
        out_shape=(jax.ShapeDtypeStruct((1, C), F32),
                   jax.ShapeDtypeStruct((1, C), F32)),
        grid=(Rp // TR,),
        in_specs=[pl.BlockSpec((TR, C), lambda r: (r, 0))],
        out_specs=(pl.BlockSpec((1, C), lambda r: (0, 0)),
                   pl.BlockSpec((1, C), lambda r: (0, 0))),
        compiler_params=_mosaic(("arbitrary",)),
    )(xp)
    mu = s / R
    var = jnp.maximum(sq / R - mu * mu, 0.0)
    return mu, jax.lax.rsqrt(var + EPS)


def _weighted_cov(xs):
    """cov = xs^T @ xs with a 2-D (i, j) output grid; LHS pre-transposed once so the
    kernel contracts the last dim (no in-kernel transpose)."""
    nrow, N = xs.shape
    TN = 512 if N >= 512 else _round_up(N, 128)
    Np = _round_up(N, TN)
    if Np != N:
        xs = jnp.pad(xs, ((0, 0), (0, Np - N)))   # zero cols -> zero cov rows/cols, sliced off
    xst = xs.T                                     # (Np, nrow): single transpose in XLA
    cov = pl.pallas_call(
        _cov_kernel,
        out_shape=jax.ShapeDtypeStruct((Np, Np), F32),
        grid=(Np // TN, Np // TN),
        in_specs=[pl.BlockSpec((TN, nrow), lambda i, j: (i, 0)),
                  pl.BlockSpec((nrow, TN), lambda i, j: (0, j))],
        out_specs=pl.BlockSpec((TN, TN), lambda i, j: (i, j)),
        compiler_params=_mosaic(("parallel", "parallel")),
    )(xst, xs)
    return cov[:N, :N]


# ----------------------------- parameters -----------------------------------

def _init_params(key, dim_2d=48, in_dim=47, dim_3d=48):
    ks = iter(jax.random.split(key, 64))

    def w(shape, scale=0.1):
        return scale * jax.random.normal(next(ks), shape, dtype=F32)

    p = {}
    # InputEmbedder (InstanceNorm2d(47) affine, Conv2d(47->48, 1x1), Embedding(5,48))
    p['ie_in_gamma'] = 1.0 + w((1, in_dim)); p['ie_in_beta'] = w((1, in_dim))
    p['ie_conv_w'] = w((in_dim, dim_2d));    p['ie_conv_b'] = w((1, dim_2d))
    p['ie_tok_emb'] = w((5, dim_2d))
    # RecyclingEmbedder (Linear(38->48), LayerNorm(pair), LayerNorm(msa))
    p['re_lin_w'] = w((RECYCLE_BINS, dim_2d)); p['re_lin_b'] = w((1, dim_2d))
    p['re_lin_w_pad'] = jnp.pad(p['re_lin_w'],
                                ((0, RECYCLE_BINS_PAD - RECYCLE_BINS), (0, 0))).astype(BF16)
    p['re_np_g'] = 1.0 + w((1, dim_2d)); p['re_np_b'] = w((1, dim_2d))
    p['re_nm_g'] = 1.0 + w((1, dim_2d)); p['re_nm_b'] = w((1, dim_2d))
    # Distogram (InstanceNorm2d(48) affine + ELU, per-head Symm+Linear -> fused 128-wide weights)
    p['dg_gamma'] = 1.0 + w((1, dim_2d)); p['dg_beta'] = w((1, dim_2d))
    nb_d = N_BINS['inter_labels']['distance']
    nb_c = N_BINS['inter_labels']['contact']
    head_ws, head_bs = [], []
    for a in OBJ['inter_labels']['distance']:
        p[f'dg_dist_{a}_w'] = w((dim_2d, nb_d)); p[f'dg_dist_{a}_b'] = w((1, nb_d))
        head_ws.append(p[f'dg_dist_{a}_w']); head_bs.append(p[f'dg_dist_{a}_b'])
    for a in OBJ['inter_labels']['contact']:
        p[f'dg_cont_{a}_w'] = w((dim_2d, nb_c)); p[f'dg_cont_{a}_b'] = w((1, nb_c))
        head_ws.append(p[f'dg_cont_{a}_w']); head_bs.append(p[f'dg_cont_{a}_b'])
    wf = jnp.concatenate(head_ws, axis=1)
    bf_ = jnp.concatenate(head_bs, axis=1)
    pad = FUSED_HEAD_WIDTH - wf.shape[1]
    p['dg_fused_w'] = jnp.pad(wf, ((0, 0), (0, pad))).astype(BF16)
    p['dg_fused_b'] = jnp.pad(bf_, ((0, 0), (0, pad)))
    # to_ss
    p['ss_ln1_g'] = 1.0 + w((1, dim_3d)); p['ss_ln1_b'] = w((1, dim_3d))
    p['ss_w1'] = w((dim_3d, dim_3d)); p['ss_b1'] = w((1, dim_3d))
    p['ss_w2'] = w((dim_3d, dim_3d)); p['ss_b2'] = w((1, dim_3d))
    p['ss_ln2_g'] = 1.0 + w((1, dim_3d)); p['ss_ln2_b'] = w((1, dim_3d))
    p['ss_w3'] = w((dim_3d, 1)); p['ss_b3'] = w((1, 1))
    # to_plddt
    p['pl_ln_g'] = 1.0 + w((1, dim_3d)); p['pl_ln_b'] = w((1, dim_3d))
    p['pl_w1'] = w((dim_3d, dim_3d)); p['pl_b1'] = w((1, dim_3d))
    p['pl_w2'] = w((dim_3d, dim_3d)); p['pl_b2'] = w((1, dim_3d))
    p['pl_w3'] = w((dim_3d, 50)); p['pl_b3'] = w((1, 50))
    p['pl_bins'] = (0.01 + 0.02 * jnp.arange(50, dtype=F32)).reshape(1, 50)
    return p


# ----------------------------- modules --------------------------------------

def _get_f2d(msa, ss, use_ss=True, penalty=4.5, cutoff=0.8):
    nrow, ncol = msa.shape
    if nrow == 1:
        msa = jnp.tile(msa.reshape(1, ncol), (2, 1)); nrow = 2
    msa1hot = (jnp.arange(5) == msa[..., None]).astype(F32)             # (nr, nc, 5)
    # reweight
    id_min = ncol * cutoff
    id_mtx = jnp.einsum('nij,mij->nm', msa1hot, msa1hot)
    w = 1.0 / (id_mtx > id_min).sum(axis=-1).astype(F32)                # (nr,)
    # msa2pssm
    beff = w.sum()
    f_i = (w[:, None, None] * msa1hot).sum(0) / beff + 1e-9
    h_i = (-f_i * jnp.log(f_i)).sum(axis=1)
    f1d = jnp.concatenate([msa1hot[0, :, :4], f_i, h_i[:, None]], axis=1)  # (nc, 10)
    # fast_dca
    x = msa1hot.reshape(nrow, ncol * 5)
    num_points = w.sum() - jnp.sqrt(w.mean())
    mean = (x * w[:, None]).sum(0, keepdims=True) / num_points
    # fold 1/num_points into the operands so the Pallas cov kernel is a pure matmul
    xs = (x - mean) * jnp.sqrt(w)[:, None] * jax.lax.rsqrt(num_points)
    cov = _weighted_cov(xs)
    cov_reg = cov + jnp.eye(ncol * 5, dtype=F32) * penalty / jnp.sqrt(w.sum())
    # TODO(synk): torch.inverse (dense LU inverse) has no clean Pallas equivalent; kept in XLA.
    inv_cov = jnp.linalg.inv(cov_reg)
    x1 = inv_cov.reshape(ncol, 5, ncol, 5)
    features = x1.transpose(0, 2, 1, 3).reshape(ncol, ncol, 25)
    x3 = jnp.sqrt((x1[:, :-1, :, :-1] ** 2).sum((1, 3))) * (1.0 - jnp.eye(ncol, dtype=F32))
    apc = x3.sum(0, keepdims=True) * x3.sum(1, keepdims=True) / x3.sum()
    contacts = (x3 - apc) * (1.0 - jnp.eye(ncol, dtype=F32))
    f2d_dca = jnp.concatenate([features, contacts[:, :, None]], axis=2)     # (nc, nc, 26)
    f2d = jnp.concatenate([jnp.tile(f1d[:, None, :], (1, ncol, 1)),
                           jnp.tile(f1d[None, :, :], (ncol, 1, 1)),
                           f2d_dca], axis=-1).reshape(1, ncol, ncol, 46)
    if use_ss:
        f2d = jnp.concatenate([f2d, ss.reshape(1, ncol, ncol, 1).astype(F32)], axis=-1)
    return f2d


def input_embedder(params, msa, ss, msa_cutoff=500, use_ss=True):
    f2d = _get_f2d(msa[0], ss, use_ss=use_ss)                 # (1, L, L, C_in) f32
    _, L, _, Cin = f2d.shape
    dim = params['ie_conv_w'].shape[1]
    x2d = f2d.reshape(L * L, Cin)                             # stream f32, cast in-kernel
    mu, rstd = _channel_stats(x2d)                            # InstanceNorm pass 1
    pair = _row_call(
        _instnorm_elu_linear_kernel, [x2d],
        [mu, rstd, params['ie_in_gamma'], params['ie_in_beta'],
         params['ie_conv_w'].astype(BF16), params['ie_conv_b']],
        jax.ShapeDtypeStruct((L * L, dim), BF16)).reshape(1, L, L, dim)
    m = params['ie_tok_emb'][msa[:, :msa_cutoff, :]]          # embedding gather (glue)
    return {'pair': pair, 'msa': m}


def recycle_add_pair(params, reprs_prev, x, ie_pair):
    """RecyclingEmbedder fused with the `reprs['pair'] + rec_pair` add; also returns
    the per-channel InstanceNorm stats of the produced pair tensor for the distogram."""
    pair_prev = reprs_prev['pair']          # (1, L, L, D) bf16
    single_prev = reprs_prev['single']      # (1, L, D)
    _, L, _, D = pair_prev.shape
    R = L * L
    d = jnp.sqrt(jnp.maximum(
        jnp.sum((x[:, :, None, :] - x[:, None, :, :]) ** 2, axis=-1), 0.0))  # cdist
    # TODO(synk): trRNA2's `one_hot(d)` binning is not given; nearest-bin over linspace(2, 40, 38).
    bins = jnp.linspace(2.0, 40.0, RECYCLE_BINS)
    idx = jnp.argmin(jnp.abs(d[..., None] - bins), axis=-1).reshape(R, 1).astype(jnp.int32)

    TR, Rp = _row_plan(R)
    prev2 = pair_prev.reshape(R, D)
    ie2 = ie_pair.reshape(R, D)
    if Rp != R:
        prev2 = jnp.pad(prev2, ((0, Rp - R), (0, 0)))
        ie2 = jnp.pad(ie2, ((0, Rp - R), (0, 0)))
        idx = jnp.pad(idx, ((0, Rp - R), (0, 0)))

    kern = functools.partial(_recycle_kernel, n_valid=R, tile_rows=TR)
    pair2, psum, psq = pl.pallas_call(
        kern,
        out_shape=(jax.ShapeDtypeStruct((Rp, D), BF16),
                   jax.ShapeDtypeStruct((1, D), F32),
                   jax.ShapeDtypeStruct((1, D), F32)),
        grid=(Rp // TR,),
        in_specs=[pl.BlockSpec((TR, D), lambda r: (r, 0)),
                  pl.BlockSpec((TR, D), lambda r: (r, 0)),
                  pl.BlockSpec((TR, 1), lambda r: (r, 0)),
                  pl.BlockSpec((1, D), lambda r: (0, 0)),
                  pl.BlockSpec((1, D), lambda r: (0, 0)),
                  pl.BlockSpec((RECYCLE_BINS_PAD, D), lambda r: (0, 0)),
                  pl.BlockSpec((1, D), lambda r: (0, 0))],
        out_specs=(pl.BlockSpec((TR, D), lambda r: (r, 0)),
                   pl.BlockSpec((1, D), lambda r: (0, 0)),
                   pl.BlockSpec((1, D), lambda r: (0, 0))),
        compiler_params=_mosaic(("arbitrary",)),
    )(prev2, ie2, idx, params['re_np_g'], params['re_np_b'],
      params['re_lin_w_pad'], params['re_lin_b'])

    mu = psum / R
    var = jnp.maximum(psq / R - mu * mu, 0.0)
    pair_stats = (mu, jax.lax.rsqrt(var + EPS))
    pair_emb = pair2[:R].reshape(1, L, L, D)

    rec_single = _row_call(
        _layernorm_kernel, [single_prev.reshape(L, D)],
        [params['re_nm_g'], params['re_nm_b']],
        jax.ShapeDtypeStruct((L, D), F32)).reshape(1, L, D)
    return rec_single, pair_emb, pair_stats


def distogram_and_ss(params, pair_repr, pair_stats):
    """Fused Distogram + to_ss heads over shared p2/pt2 tiles."""
    mu, rstd = pair_stats
    _, L, _, D = pair_repr.shape
    p3 = pair_repr.reshape(L, L, D)
    p2 = p3.reshape(L * L, D)
    # One shared bf16 transposed copy of the pair tensor for all Symm() consumers.
    # TODO(synk): a swapped (i,j)->(j,i) BlockSpec index_map would avoid even this copy,
    # but needs an in-kernel major<->sublane transpose that Mosaic does not lower reliably.
    pt2 = jnp.swapaxes(p3, 0, 1).reshape(L * L, D)
    out = _row_call(
        _heads_ss_kernel, [p2, pt2],
        [mu, rstd, params['dg_gamma'], params['dg_beta'],
         params['dg_fused_w'], params['dg_fused_b'],
         params['ss_ln1_g'], params['ss_ln1_b'],
         params['ss_w1'].astype(BF16), params['ss_b1'],
         params['ss_w2'].astype(BF16), params['ss_b2'],
         params['ss_ln2_g'], params['ss_ln2_b'],
         params['ss_w3'].astype(BF16), params['ss_b3']],
        jax.ShapeDtypeStruct((L * L, FUSED_HEAD_WIDTH), BF16))
    nb = N_BINS['inter_labels']['distance']
    pred = {'inter_labels': {'distance': {}, 'contact': {}}, 'intra_labels': {}}
    for s, a in enumerate(OBJ['inter_labels']['distance']):
        pred['inter_labels']['distance'][a] = out[:, s * nb:(s + 1) * nb].astype(F32).reshape(L, L, nb)
    for s, a in enumerate(OBJ['inter_labels']['contact']):
        pred['inter_labels']['contact'][a] = out[:, N_DIST_LANES + s].astype(F32).reshape(L, L)
    ss_out = out[:, SS_LANE].astype(F32).reshape(1, L, L, 1)
    return pred, ss_out


def to_plddt(params, single):
    # TODO(synk): in the original this consumes StructureModule's stacked single repr (l, b, i, d).
    _, L, D = single.shape
    prob, plddt = _row_call(
        _plddt_kernel, [single.reshape(L, D)],
        [params['pl_ln_g'], params['pl_ln_b'],
         params['pl_w1'].astype(BF16), params['pl_b1'],
         params['pl_w2'].astype(BF16), params['pl_b2'],
         params['pl_w3'].astype(BF16), params['pl_b3'], params['pl_bins']],
        (jax.ShapeDtypeStruct((L, 50), F32), jax.ShapeDtypeStruct((L, 1), F32)))
    return prob.reshape(1, 1, L, 50), plddt.reshape(1, 1, L)


def folding_forward(params, raw_seq, msa, ss, num_recycle=1, msa_cutoff=500):
    # InputEmbedder is recycle-invariant (runs under no_grad on the same msa/ss each
    # cycle in the original) -> hoisted out of the loop.
    reprs0 = input_embedder(params, msa, ss, msa_cutoff=msa_cutoff)
    L = reprs0['pair'].shape[1]
    reprs_prev = {'pair': jnp.zeros_like(reprs0['pair']),
                  'single': jnp.zeros_like(reprs0['msa'][:, 0]),
                  'x': jnp.zeros((reprs0['pair'].shape[0], L, 3), F32)}
    outputs_all, outputs = {}, {}
    for c in range(1 + num_recycle):
        t = reprs_prev['x']
        rec_single, pair_emb, pair_stats = recycle_add_pair(params, reprs_prev, t, reprs0['pair'])
        msa_emb = reprs0['msa'].at[:, 0].add(rec_single)
        # TODO(synk): RNAformer (net2d) is not part of the provided module set; pass-through here.
        pair_repr, msa_repr = pair_emb, msa_emb
        # TODO(synk): StructureModule / InitStr_Network not provided; 3D outputs (frames, coords) omitted.
        single_repr = msa_repr[:, 0]
        reprs_prev = {'single': msa_repr[..., 0, :, :],
                      'pair': pair_repr,
                      'x': jnp.zeros_like(t)}  # TODO(synk): should be predicted C1' coords.
        if c == num_recycle:
            outputs = {}
            geoms, ss_out = distogram_and_ss(params, pair_repr, pair_stats)
            outputs['geoms'] = geoms
            outputs['ss'] = ss_out
            plddt_prob, plddt = to_plddt(params, single_repr)
            outputs['plddt_prob'] = plddt_prob
            outputs['plddt'] = plddt
            outputs['single'] = single_repr
            outputs['pair'] = pair_repr
            outputs_all[c] = outputs
    return outputs_all, outputs


if __name__ == "__main__":
    key = jax.random.PRNGKey(0)
    k_msa, k_ss, k_param = jax.random.split(key, 3)
    L, nrow, dim_2d = 16, 4, 48
    msa = jax.random.randint(k_msa, (1, nrow, L), 0, 5, dtype=jnp.int32)
    ss = (jax.random.uniform(k_ss, (1, L, L)) > 0.5).astype(F32)
    ss = 0.5 * (ss + ss.transpose(0, 2, 1))
    params = _init_params(k_param, dim_2d=dim_2d, in_dim=47, dim_3d=dim_2d)
    raw_seq = "ACGU" * (L // 4)

    outputs_all, outputs = folding_forward(params, raw_seq, msa, ss, num_recycle=1)
    jax.block_until_ready(outputs)

    assert outputs['geoms']['inter_labels']['distance']['PP'].shape == (L, L, 40)
    assert outputs['geoms']['inter_labels']['contact']['PP'].shape == (L, L)
    assert outputs['ss'].shape == (1, L, L, 1)
    assert outputs['plddt_prob'].shape == (1, 1, L, 50)
    assert outputs['plddt'].shape == (1, 1, L)
    print("KERNEL_OK")
</pallas_src>

<mosaic_0001>
module attributes {stable_mosaic.version = 11 : i64} {
  func.func @_cov_kernel(%arg0: i32, %arg1: i32, %arg2: memref<128x4xf32, #tpu.memory_space<vmem>>, %arg3: memref<4x128xf32, #tpu.memory_space<vmem>>, %arg4: memref<128x128xf32, #tpu.memory_space<vmem>>) attributes {dimension_semantics = [#tpu.dimension_semantics<parallel>, #tpu.dimension_semantics<parallel>], iteration_bounds = array<i64: 1, 1>, scalar_prefetch = 0 : i64, scratch_operands = 0 : i64, tpu.core_type = #tpu.core_type<tc>, window_params = [{transform_indices = @transform_0, window_bounds = array<i64: 128, 4>}, {transform_indices = @transform_1, window_bounds = array<i64: 4, 128>}, {transform_indices = @transform_2, window_bounds = array<i64: 128, 128>}]} {
    %c0 = arith.constant 0 : index
    %c0_0 = arith.constant 0 : index
    %0 = vector.load %arg2[%c0, %c0_0] : memref<128x4xf32, #tpu.memory_space<vmem>>, vector<128x4xf32>
    %c0_1 = arith.constant 0 : index
    %c0_2 = arith.constant 0 : index
    %1 = vector.load %arg3[%c0_1, %c0_2] : memref<4x128xf32, #tpu.memory_space<vmem>>, vector<4x128xf32>
    %cst = arith.constant dense<0.000000e+00> : vector<128x128xf32>
    %2 = tpu.matmul %0, %1, %cst {dimension_numbers = #tpu.dot_dimension_numbers<[1], [0], [0], [1], [0, 0, 1, 1], [], []>} : vector<128x4xf32>, vector<4x128xf32>, vector<128x128xf32> -> vector<128x128xf32>
    %c0_3 = arith.constant 0 : index
    %c0_4 = arith.constant 0 : index
    %3 = vector.load %arg4[%c0_3, %c0_4] : memref<128x128xf32, #tpu.memory_space<vmem>>, vector<128x128xf32>
    tpu.vector_store %arg4[%c0_3, %c0_4], %2 {strides = array<i32>} : memref<128x128xf32, #tpu.memory_space<vmem>>, vector<128x128xf32>,
    return
  }
  func.func @transform_0(%arg0: i32, %arg1: i32) -> (i32, i32) {
    %c0_i32 = arith.constant 0 : i32
    %c0_i32_0 = arith.constant 0 : i32
    return %arg0, %c0_i32 : i32, i32
  }
  func.func @transform_1(%arg0: i32, %arg1: i32) -> (i32, i32) {
    %c0_i32 = arith.constant 0 : i32
    %c0_i32_0 = arith.constant 0 : i32
    return %c0_i32, %arg1 : i32, i32
  }
  func.func @transform_2(%arg0: i32, %arg1: i32) -> (i32, i32) {
    %c0_i32 = arith.constant 0 : i32
    return %arg0, %arg1 : i32, i32
  }
}

</mosaic_0001>

<bundles_post_ra>
// kernel: tpu_custom_call.1
= control target key start
LH: loop header
LB: loop body
LE: loop exit
PB: predicated region body
PF: predicated region fallthrough
CT: control target
= control target key end

     0   :  { %7 = vsyncpa [#allocation3], 0  ;;  %s504_s0 = inlined_call_operand.hbm [shape: f32[128,4], index: 0, kind: input, shape index: {}]   ;;  %s505_s1 = inlined_call_operand.hbm [shape: f32[4,128], index: 1, kind: input, shape index: {}]   ;;  %s506_s2 = inlined_call_operand.hbm [shape: f32[128,128], index: 2, kind: output, shape index: {}]  }
   0x1   :  { %8 = vsyncpa [#allocation6], 0 }
   0x2   :  { %9 = vsyncpa [#allocation4], 0  ;;  %s426_s9 = smov [#allocation2]   ;;  %s354_s13 = scalar_lea.hbm %s504_s0, 2048 }
   0x3   :  { %s15_s10 = sshll.u32 %s426_s9, 4  ;;  %p355_p0 = scmp.ne.s32.totalorder %s504_s0, %s354_s13  ;;  %s16_s10 = int_to_ptr.vmem [resolvable:$true] %s15_s10 }
   0x4   :  { %p358_p1 = scmp.lt.u32.totalorder %s354_s13, %s504_s0 }
   0x6   :  { %p360_p2 = pnand %p358_p1, %p355_p0 }
   0x8   :  { %363 = shalt.err (!%p360_p2)
}
   0x9   :  { %s364_s18 = scalar_lea.vmem %s16_s10, 2048  ;;  %p369_p4 = scmp.lt.s32.totalorder %s16_s10, %s16_s10 }
   0xa   :  { %p365_p3 = scmp.ne.s32.totalorder %s16_s10, %s364_s18  ;;  %p370_p5 = scmp.lt.s32.totalorder %s364_s18, %s364_s18 }
   0xc   :  { %p371_p6 = por %p370_p5, %p369_p4 }
   0xe   :  { %p372_p7 = pnand %p371_p6, %p365_p3 }
  0x10   :  { %375 = shalt.err (!%p372_p7)
}
  0x11   :  { %s427_s19 = smov 128   ;;  %s428_s20 = smov 8  }
  0x12   :  { %21 = dma.hbm_to_vmem [thread:$0]  %s504_s0, 2048, %s16_s10, [#allocation3], %s427_s19, %s427_s19, %s428_s20  }
  0x13   :  { %s429_s23 = smov [#allocation5]   ;;  %s376_s27 = scalar_lea.hbm %s505_s1, 64 }
  0x14   :  { %s28_s24 = sshll.u32 %s429_s23, 4  ;;  %p377_p8 = scmp.ne.s32.totalorder %s505_s1, %s376_s27  ;;  %s29_s24 = int_to_ptr.vmem [resolvable:$true] %s28_s24 }
  0x15   :  { %p380_p9 = scmp.lt.u32.totalorder %s376_s27, %s505_s1 }
  0x17   :  { %p382_p10 = pnand %p380_p9, %p377_p8 }
  0x19   :  { %385 = shalt.err (!%p382_p10)
}
  0x1a   :  { %s386_s4 = scalar_lea.vmem %s29_s24, 64  ;;  %p391_p12 = scmp.lt.s32.totalorder %s29_s24, %s29_s24 }
  0x1b   :  { %p387_p11 = scmp.ne.s32.totalorder %s29_s24, %s386_s4  ;;  %p392_p13 = scmp.lt.s32.totalorder %s386_s4, %s386_s4 }
  0x1d   :  { %p393_p0 = por %p392_p13, %p391_p12 }
  0x1f   :  { %p394_p1 = pnand %p393_p0, %p387_p11 }
  0x21   :  { %397 = shalt.err (!%p394_p1)
}
  0x22   :  { %31 = dma.hbm_to_vmem [thread:$0]  %s505_s1, 64, %s29_s24, [#allocation6]  }
  0x23   :  { %420 = dma.done.wait [#allocation3], 2048  }
  0x24   :  { %421 = vsyncadd [#allocation3], 4294965248 }
  0x25   :  { %422 = dma.done.wait [#allocation6], 64  }
  0x26   :  { %423 = vsyncadd [#allocation6], 4294967232  ;;  %vm104_vm0 = vcmask 1043456   ;;  %v54_v0 = vld [vmem:[#allocation5] sm:$0xf]  ;;  %vm55_vm1 = vcmask 31744  }
  0x27   :  { %v38_v1 = vld [vmem:[#allocation2] sm:$0xff]  ;;  %321 = vmatprep.subr.msk.mxu0 %vm104_vm0, %v54_v0  ;;  %347 = vmatprep.subr.msk.mxu1 %vm104_vm0, %v54_v0  ;;  %v39_v3 = vld [vmem:[#allocation2 + $0x8] sm:$0xff]  ;;  %v40_v5 = vld [vmem:[#allocation2 + $0x10] sm:$0xff]  ;;  %s430_s1 = smov [#allocation7]  }
  0x28   :  { %v46_v2 = vld [vmem:[#allocation2 + $0x40] sm:$0xff]  ;;  %v47_v4 = vld [vmem:[#allocation2 + $0x48] sm:$0xff]  ;;  %322 = vmatpush3.msk.msra.mxu0 %vm104_vm0, %v54_v0  ;;  %348 = vmatpush3.msk.msra.mxu1 %vm104_vm0, %v54_v0  ;;  %v48_v6 = vld [vmem:[#allocation2 + $0x50] sm:$0xff]  ;;  %s274_s6 = sshll.u32 %s430_s1, 4  ;;  %s275_s6 = int_to_ptr.vmem [resolvable:$true] %s274_s6 }
  0x29   :  { %323 = vmatprep.mubr.msk.f32.mxu0 %vm55_vm1, %v38_v1  ;;  %335 = vmatprep.mubr.msk.f32.mxu1 %vm55_vm1, %v46_v2  ;;  %v41_v7 = vld [vmem:[#allocation2 + $0x18] sm:$0xff]  ;;  %v42_v9 = vld [vmem:[#allocation2 + $0x20] sm:$0xff]  ;;  %v43_v11 = vld [vmem:[#allocation2 + $0x28] sm:$0xff]  ;;  %s398_s7 = scalar_lea.vmem %s275_s6, 2048  ;;  %p403_p3 = scmp.lt.s32.totalorder %s275_s6, %s275_s6 }
  0x2a   :  { %324 = vmatmul.mubr.msk.f32.vlgmr.msra.gmra.mrb[0].mxu0 %vm55_vm1, %v39_v3  ;;  %336 = vmatmul.mubr.msk.f32.vlgmr.msra.gmra.mrb[0].mxu1 %vm55_vm1, %v47_v4  ;;  %v49_v8 = vld [vmem:[#allocation2 + $0x58] sm:$0xff]  ;;  %v50_v10 = vld [vmem:[#allocation2 + $0x60] sm:$0xff]  ;;  %v51_v12 = vld [vmem:[#allocation2 + $0x68] sm:$0xff]  ;;  %p399_p2 = scmp.ne.s32.totalorder %s275_s6, %s398_s7  ;;  %p404_p4 = scmp.lt.s32.totalorder %s398_s7, %s398_s7 }
  0x2b   :  { %326 = vmatprep.mubr.msk.f32.mxu0 %vm55_vm1, %v40_v5  ;;  %338 = vmatprep.mubr.msk.f32.mxu1 %vm55_vm1, %v48_v6  ;;  %v44_v13 = vld [vmem:[#allocation2 + $0x30] sm:$0xff]  ;;  %v45_v15 = vld [vmem:[#allocation2 + $0x38] sm:$0xff] }
  0x2c   :  { %v52_v14 = vld [vmem:[#allocation2 + $0x70] sm:$0xff]  ;;  %v53_v16 = vld [vmem:[#allocation2 + $0x78] sm:$0xff]  ;;  %p405_p5 = por %p404_p4, %p403_p3 }
  0x2e   :  { %327 = vmatmul.mubr.msk.f32.gmra.mrb[2].mxu0 %vm55_vm1, %v41_v7  ;;  %339 = vmatmul.mubr.msk.f32.gmra.mrb[2].mxu1 %vm55_vm1, %v49_v8  ;;  %p406_p6 = pnand %p405_p5, %p399_p2 }
  0x2f   :  { %329 = vmatprep.mubr.msk.f32.mxu0 %vm55_vm1, %v42_v9  ;;  %341 = vmatprep.mubr.msk.f32.mxu1 %vm55_vm1, %v50_v10 }
  0x32   :  { %330 = vmatmul.mubr.msk.f32.gmra.mrb[4].mxu0 %vm55_vm1, %v43_v11  ;;  %342 = vmatmul.mubr.msk.f32.gmra.mrb[4].mxu1 %vm55_vm1, %v51_v12 }
  0x33   :  { %332 = vmatprep.mubr.msk.f32.mxu0 %vm55_vm1, %v44_v13  ;;  %344 = vmatprep.mubr.msk.f32.mxu1 %vm55_vm1, %v52_v14 }
  0x36   :  { %333 = vmatmul.mubr.msk.f32.gmra.mrb[6].mxu0 %vm55_vm1, %v45_v15  ;;  %345 = vmatmul.mubr.msk.f32.gmra.mrb[6].mxu1 %vm55_vm1, %v53_v16 }
  0xfd   :  { %v325_v17 = vpop.f32.mrb[0].mxu0  ;;  %v337_v18 = vpop.f32.mrb[0].mxu1 }
  0xfe   :  { %254 = vst [vmem:[#allocation7 + $0x8] sm:$0xff] %v325_v17  ;;  %262 = vst [vmem:[#allocation7 + $0x48] sm:$0xff] %v337_v18  ;;  %v174_v19 = vpop.f32.mrb[1].mxu0  ;;  %v214_v20 = vpop.f32.mrb[1].mxu1 }
  0xff   :  { %253 = vst [vmem:[#allocation7] sm:$0xff] %v174_v19  ;;  %261 = vst [vmem:[#allocation7 + $0x40] sm:$0xff] %v214_v20 }
 0x101   :  { %v328_v21 = vpop.f32.mrb[2].mxu0  ;;  %v340_v22 = vpop.f32.mrb[2].mxu1 }
 0x102   :  { %256 = vst [vmem:[#allocation7 + $0x18] sm:$0xff] %v328_v21  ;;  %264 = vst [vmem:[#allocation7 + $0x58] sm:$0xff] %v340_v22  ;;  %v184_v23 = vpop.f32.mrb[3].mxu0  ;;  %v224_v24 = vpop.f32.mrb[3].mxu1 }
 0x103   :  { %255 = vst [vmem:[#allocation7 + $0x10] sm:$0xff] %v184_v23  ;;  %263 = vst [vmem:[#allocation7 + $0x50] sm:$0xff] %v224_v24 }
 0x105   :  { %v331_v25 = vpop.f32.mrb[4].mxu0  ;;  %v343_v26 = vpop.f32.mrb[4].mxu1 }
 0x106   :  { %258 = vst [vmem:[#allocation7 + $0x28] sm:$0xff] %v331_v25  ;;  %266 = vst [vmem:[#allocation7 + $0x68] sm:$0xff] %v343_v26  ;;  %v194_v27 = vpop.f32.mrb[5].mxu0  ;;  %v234_v28 = vpop.f32.mrb[5].mxu1 }
 0x107   :  { %257 = vst [vmem:[#allocation7 + $0x20] sm:$0xff] %v194_v27  ;;  %265 = vst [vmem:[#allocation7 + $0x60] sm:$0xff] %v234_v28 }
 0x109   :  { %v334_v29 = vpop.f32.mrb[6].mxu0  ;;  %v346_v30 = vpop.f32.mrb[6].mxu1 }
 0x10a   :  { %260 = vst [vmem:[#allocation7 + $0x38] sm:$0xff] %v334_v29  ;;  %268 = vst [vmem:[#allocation7 + $0x78] sm:$0xff] %v346_v30  ;;  %v204_v31 = vpop.f32.mrb[7].mxu0  ;;  %v244_v32 = vpop.f32.mrb[7].mxu1 }
 0x10b   :  { %259 = vst [vmem:[#allocation7 + $0x30] sm:$0xff] %v204_v31  ;;  %267 = vst [vmem:[#allocation7 + $0x70] sm:$0xff] %v244_v32 }
 0x10c   :  { %409 = shalt.err (!%p406_p6)
}
 0x10d   :  { %s410_s10 = scalar_lea.hbm %s506_s2, 2048 }
 0x10e   :  { %p411_p7 = scmp.ne.s32.totalorder %s506_s2, %s410_s10  ;;  %p414_p8 = scmp.lt.u32.totalorder %s410_s10, %s506_s2 }
 0x110   :  { %p416_p9 = pnand %p414_p8, %p411_p7 }
 0x112   :  { %419 = shalt.err (!%p416_p9)
}
 0x113   :  { %280 = dma.vmem_to_hbm [thread:$0]  %s275_s6, 2048, %s506_s2, [#allocation4], %s427_s19, %s427_s19, %s428_s20  }
 0x114   :  { %424 = dma.done.wait [#allocation4], 2048  }
 0x115   :  { %425 = vsyncadd [#allocation4], 4294965248 }
 0x116   :  { %284 = vsyncpa [#allocation3], 1 }
 0x117   :  { %285 = vsyncpa [#allocation6], 1 }
 0x118   :  { %286 = vsyncpa [#allocation4], 1 }

</bundles_post_ra>
